<compile_context>
chip_gen: v5e
topology: v5e:2x2
jax: 0.10.0
libtpu: 0.0.40
codegen_flags: <defaults>
</compile_context>

<pallas_src>
import functools
import math

import numpy as np
import jax
import jax.numpy as jnp
from jax.experimental import pallas as pl
from jax.experimental.pallas import tpu as pltpu

HISTORY_LEN = 12        # FFTGate history_len
GAMMA1_INIT = 1.5
PHI = 0.1
LANE = 128


def _round_up(x, m):
    return (x + m - 1) // m * m


# ----------------------------------------------------------------------------
# Pallas kernel: full Decoder.forward hot path
# ----------------------------------------------------------------------------
def _decoder_kernel(phi, freq_factor, smoothing, vout, hsz, t_len,
                    tok_ref, emb_ref, dft_ref, wl_ref, wf_ref, gamma_ref,
                    state_ref, out_ref):
    n = tok_ref.shape[0]
    vin = emb_ref.shape[0]
    pack = out_ref.shape[1]
    hoff = vout + 2 * hsz              # start of the history columns in the packed state

    # ---- Embedding lookup (exact, one-hot matmul on the MXU) ----
    # TODO(synk): for a realistic vocabulary keep emb_table in HBM (memory_space=pl.ANY) and
    # DMA-gather the N rows instead -- the full fp32 table + double buffering will not fit
    # v7x's 64 MiB VMEM and the one-hot matmul is O(N*V*E) wasted work.
    tok = tok_ref[...]                                                    # (N, 1) int32
    iota = jax.lax.broadcasted_iota(jnp.int32, (n, vin), 1)
    onehot = (iota == tok).astype(jnp.float32)                            # (N, Vin)
    emb = jnp.dot(onehot, emb_ref[...], preferred_element_type=jnp.float32)   # (N, E)

    # ---- FFTGate activation ----
    xm = jnp.mean(emb, axis=1, keepdims=True)                             # (N, 1) per-batch mean
    hist = state_ref[:, hoff:hoff + t_len]                                # (N, T) prev history

    # shift + append(x_mean) + FFT over the time axis folded into ONE real matmul:
    #   [re | im] = [hist | x_mean] @ dft_aug,   dft_aug: (T+1, 2T)
    hist_aug = jnp.concatenate([hist, xm], axis=1)                        # (N, T+1)
    re_im = jnp.dot(hist_aug, dft_ref[...], preferred_element_type=jnp.float32)  # (N, 2T)
    re = re_im[:, :t_len]
    im = re_im[:, t_len:]
    fm = jnp.mean(jnp.sqrt(re * re + im * im), axis=1, keepdims=True)     # (N, 1) mean |fft|
    fm = jnp.clip(fm, 0.05, 1.5)
    fm = (1.0 - smoothing) * fm + smoothing * jnp.mean(fm, keepdims=True)

    gamma = jnp.clip(gamma_ref[0, 0], 0.1, 6.0)                           # scalar from SMEM
    gate = jax.nn.sigmoid(gamma * emb - freq_factor * fm)                 # (N, E)
    act = emb * gate + 0.05 * jnp.sin(phi * emb)
    # TODO(synk): nn.Dropout is identity here (eval semantics); training-mode RNG dropout omitted.

    # ---- LSTM cell (num_layers=1, seq_len=1) fused into a single MXU push ----
    # gates = [act | h0 | 1] @ [W_ih^T ; W_hh^T ; b_ih+b_hh]  -> (N, 4H), PyTorch order i,f,g,o
    h0 = state_ref[:, vout:vout + hsz]
    c0 = state_ref[:, vout + hsz:vout + 2 * hsz]
    ones = jnp.ones((n, 1), jnp.float32)
    zcat = jnp.concatenate([act, h0, ones], axis=1)                       # (N, E+H+1)
    gates = jnp.dot(zcat, wl_ref[...], preferred_element_type=jnp.float32)    # (N, 4H)
    i_g = jax.nn.sigmoid(gates[:, 0 * hsz:1 * hsz])
    f_g = jax.nn.sigmoid(gates[:, 1 * hsz:2 * hsz])
    g_g = jnp.tanh(gates[:, 2 * hsz:3 * hsz])
    o_g = jax.nn.sigmoid(gates[:, 3 * hsz:4 * hsz])
    c1 = f_g * c0 + i_g * g_g
    h1 = o_g * jnp.tanh(c1)

    # ---- Output projection (bias folded via the ones column) ----
    pred = jnp.dot(jnp.concatenate([h1, ones], axis=1), wf_ref[...],
                   preferred_element_type=jnp.float32)                    # (N, Vout)

    # ---- Updated FFTGate history (functional replacement of the PyTorch buffer) ----
    new_hist = jnp.concatenate([hist[:, 1:], xm], axis=1)                 # (N, T)

    # ---- Single lane-dense packed store: [pred | h1 | c1 | new_hist | 0-pad] ----
    pieces = [pred, h1, c1, new_hist]
    pad = pack - hoff - t_len
    if pad > 0:
        pieces.append(jnp.zeros((n, pad), jnp.float32))
    out_ref[...] = jnp.concatenate(pieces, axis=1)


# ----------------------------------------------------------------------------
# Constant DFT/shift matrix (exact fold of cat(hist[1:], x_mean) + torch.fft.fft)
# ----------------------------------------------------------------------------
def _dft_aug_matrix(t_len):
    k = np.arange(t_len).reshape(t_len, 1)
    t = np.arange(t_len).reshape(1, t_len)
    ang = 2.0 * np.pi * k * t / t_len
    cmat = np.cos(ang)                      # Re(DFT)
    smat = -np.sin(ang)                     # Im(DFT)
    shift = np.eye(t_len, k=1)              # drops the oldest history row
    acos = (cmat @ shift).T                 # (T, T)   (transposed-history form)
    asin = (smat @ shift).T
    ccos = cmat[:, t_len - 1].reshape(1, t_len)   # coefficient of the appended x_mean
    csin = smat[:, t_len - 1].reshape(1, t_len)
    top = np.concatenate([acos, asin], axis=1)    # (T, 2T)
    bot = np.concatenate([ccos, csin], axis=1)    # (1, 2T)
    return jnp.asarray(np.concatenate([top, bot], axis=0), dtype=jnp.float32)  # (T+1, 2T)


# ----------------------------------------------------------------------------
# Parameters + wrappers
# ----------------------------------------------------------------------------
def init_decoder_params(key, input_size, embedding_size, hidden_size, output_size):
    ks = jax.random.split(key, 7)
    scale = 1.0 / math.sqrt(hidden_size)
    return {
        "emb_table": jax.random.normal(ks[0], (input_size, embedding_size), jnp.float32),
        "w_ih": jax.random.uniform(ks[1], (4 * hidden_size, embedding_size), jnp.float32, -scale, scale),
        "w_hh": jax.random.uniform(ks[2], (4 * hidden_size, hidden_size), jnp.float32, -scale, scale),
        "b_ih": jax.random.uniform(ks[3], (4 * hidden_size,), jnp.float32, -scale, scale),
        "b_hh": jax.random.uniform(ks[4], (4 * hidden_size,), jnp.float32, -scale, scale),
        "w_fc": jax.random.uniform(ks[5], (output_size, hidden_size), jnp.float32, -scale, scale),
        "b_fc": jax.random.uniform(ks[6], (output_size,), jnp.float32, -scale, scale),
        "gamma1": jnp.full((1, 1), GAMMA1_INIT, jnp.float32),
    }


def prepare_decoder(params, epoch=0):
    """Precompute kernel-ready constants once (hoist out of the autoregressive decode loop)."""
    hsz = params["w_hh"].shape[1]
    vout = params["w_fc"].shape[0]
    # Fused LSTM weights: rows = [W_ih^T ; W_hh^T ; b_ih+b_hh], gate order i, f, g, o.
    w_lstm = jnp.concatenate(
        [params["w_ih"].T, params["w_hh"].T,
         (params["b_ih"] + params["b_hh"]).reshape(1, 4 * hsz)], axis=0)          # (E+H+1, 4H)
    w_fc = jnp.concatenate([params["w_fc"].T, params["b_fc"].reshape(1, vout)], axis=0)  # (H+1, V)
    # TODO(synk): on v6e/v7x cast emb_table / w_lstm / w_fc to bfloat16 here to halve weight DMA
    # bytes (keep f32 accumulation via preferred_element_type and f32 elementwise math).
    return {
        "emb_table": params["emb_table"],
        "w_lstm": w_lstm,
        "w_fc": w_fc,
        "gamma": params["gamma1"].reshape(1, 1),
        "dft": _dft_aug_matrix(HISTORY_LEN),
        "phi": float(PHI),
        "freq_factor": float(min(0.3 + 0.007 * epoch, 0.8)),
        "smoothing": float(max(0.1, 1.0 / (epoch + 10))),
        "hsz": hsz,
        "vout": vout,
        "t_len": HISTORY_LEN,
    }


def decoder_step(prep, tokens, state_pack):
    """One decode step on the packed recurrent state (N, PACK) = [pred | h | c | hist | pad]."""
    n = tokens.shape[0]
    hsz, vout, t_len = prep["hsz"], prep["vout"], prep["t_len"]
    pack = state_pack.shape[1]

    kernel = functools.partial(_decoder_kernel, prep["phi"], prep["freq_factor"],
                               prep["smoothing"], vout, hsz, t_len)
    vmem = pl.BlockSpec(memory_space=pltpu.MemorySpace.VMEM)
    smem = pl.BlockSpec(memory_space=pltpu.MemorySpace.SMEM)
    # TODO(synk): for large batches add a 1-D "parallel" grid over N (128-row blocks) so the two
    # v7x TensorCores split the batch and input/output DMAs pipeline with compute.
    return pl.pallas_call(
        kernel,
        out_shape=jax.ShapeDtypeStruct((n, pack), jnp.float32),
        in_specs=[vmem, vmem, vmem, vmem, vmem, smem, vmem],
        out_specs=vmem,
        input_output_aliases={6: 0},      # recurrent state updated in place
    )(tokens.reshape(n, 1).astype(jnp.int32),
      prep["emb_table"], prep["dft"], prep["w_lstm"], prep["w_fc"],
      prep["gamma"], state_pack)


def decoder_forward(params, tokens, hidden, cell, epoch=0, history=None):
    """PyTorch-like interface. tokens (N,) int32; hidden/cell (1, N, H).
    Returns (pred (N, Vout), hidden, cell, history (N, T))."""
    prep = prepare_decoder(params, epoch)
    n = tokens.shape[0]
    hsz, vout, t_len = prep["hsz"], prep["vout"], prep["t_len"]
    pack = _round_up(vout + 2 * hsz + t_len, LANE)

    if history is None:                    # fresh zero buffer, like PyTorch's first call
        history = jnp.zeros((n, t_len), jnp.float32)
    state = jnp.zeros((n, pack), jnp.float32)
    state = state.at[:, vout:vout + hsz].set(hidden[0])
    state = state.at[:, vout + hsz:vout + 2 * hsz].set(cell[0])
    state = state.at[:, vout + 2 * hsz:vout + 2 * hsz + t_len].set(history)

    out = decoder_step(prep, tokens, state)

    pred = out[:, :vout]
    h1 = out[:, vout:vout + hsz][None]
    c1 = out[:, vout + hsz:vout + 2 * hsz][None]
    new_hist = out[:, vout + 2 * hsz:vout + 2 * hsz + t_len]
    return pred, h1, c1, new_hist


# ----------------------------------------------------------------------------
# Pure-JAX reference of the PyTorch forward (for correctness checking)
# ----------------------------------------------------------------------------
def _reference_forward(params, tokens, hidden, cell, epoch, history_tn):
    emb = params["emb_table"][tokens]                                     # (N, E)
    xm = emb.mean(axis=1)                                                 # (N,)
    new_hist = jnp.concatenate([history_tn[1:], xm[None, :]], axis=0)     # (T, N) PyTorch layout
    fm = jnp.abs(jnp.fft.fft(new_hist, axis=0)).mean(axis=0)              # (N,)
    fm = jnp.clip(fm, 0.05, 1.5)
    s = max(0.1, 1.0 / (epoch + 10))
    fm = (1.0 - s) * fm + s * fm.mean()
    gamma = jnp.clip(params["gamma1"][0, 0], 0.1, 6.0)
    ff = min(0.3 + 0.007 * epoch, 0.8)
    gate = jax.nn.sigmoid(gamma * emb - ff * fm[:, None])
    act = emb * gate + 0.05 * jnp.sin(PHI * emb)
    h0, c0 = hidden[0], cell[0]
    hsz = params["w_hh"].shape[1]
    z = act @ params["w_ih"].T + h0 @ params["w_hh"].T + params["b_ih"] + params["b_hh"]
    i = jax.nn.sigmoid(z[:, :hsz]); f = jax.nn.sigmoid(z[:, hsz:2 * hsz])
    g = jnp.tanh(z[:, 2 * hsz:3 * hsz]); o = jax.nn.sigmoid(z[:, 3 * hsz:])
    c1 = f * c0 + i * g
    h1 = o * jnp.tanh(c1)
    pred = h1 @ params["w_fc"].T + params["b_fc"]
    return pred, h1[None], c1[None], new_hist


if __name__ == "__main__":
    # Small shapes consistent with the module: batch N=8, vocab_in=64, embedding=32,
    # hidden=32, vocab_out=64, num_layers=1.
    N, VIN, E, H, VOUT = 8, 64, 32, 32, 64

    key = jax.random.PRNGKey(0)
    k_tok, k_h, k_c, k_param = jax.random.split(key, 4)

    tokens = jax.random.randint(k_tok, (N,), 0, VIN, dtype=jnp.int32)     # x: (N,)
    hidden0 = jax.random.normal(k_h, (1, N, H), jnp.float32)              # (num_layers, N, H)
    cell0 = jax.random.normal(k_c, (1, N, H), jnp.float32)
    params = init_decoder_params(k_param, VIN, E, H, VOUT)

    # step 1 (fresh zero history, like PyTorch's first call)
    pred1, h1, c1, hist1 = decoder_forward(params, tokens, hidden0, cell0, epoch=0)
    # step 2 threads the updated recurrent state + FFTGate history (the previously missing bit)
    tok2 = jnp.argmax(pred1, axis=-1).astype(jnp.int32)
    pred2, h2, c2, hist2 = decoder_forward(params, tok2, h1, c1, epoch=0, history=hist1)
    jax.block_until_ready((pred1, h1, c1, hist1, pred2, h2, c2, hist2))

    # correctness vs a pure-JAX reference of the PyTorch forward (two chained steps)
    r_pred1, r_h1, r_c1, r_hist1 = _reference_forward(
        params, tokens, hidden0, cell0, 0, jnp.zeros((HISTORY_LEN, N), jnp.float32))
    r_pred2, r_h2, r_c2, r_hist2 = _reference_forward(params, tok2, r_h1, r_c1, 0, r_hist1)
    np.testing.assert_allclose(np.asarray(pred1), np.asarray(r_pred1), rtol=2e-3, atol=2e-3)
    np.testing.assert_allclose(np.asarray(h1), np.asarray(r_h1), rtol=2e-3, atol=2e-3)
    np.testing.assert_allclose(np.asarray(c1), np.asarray(r_c1), rtol=2e-3, atol=2e-3)
    np.testing.assert_allclose(np.asarray(hist1), np.asarray(r_hist1.T), rtol=2e-3, atol=2e-3)
    np.testing.assert_allclose(np.asarray(pred2), np.asarray(r_pred2), rtol=2e-3, atol=2e-3)
    np.testing.assert_allclose(np.asarray(hist2), np.asarray(r_hist2.T), rtol=2e-3, atol=2e-3)

    assert pred1.shape == (N, VOUT) and h1.shape == (1, N, H) and c1.shape == (1, N, H)
    assert hist1.shape == (N, HISTORY_LEN)
    print("KERNEL_OK")
</pallas_src>

<mosaic_0001>
module attributes {stable_mosaic.version = 11 : i64} {
  func.func @_decoder_kernel(%arg0: memref<8x1xi32, #tpu.memory_space<vmem>>, %arg1: memref<64x32xf32, #tpu.memory_space<vmem>>, %arg2: memref<13x24xf32, #tpu.memory_space<vmem>>, %arg3: memref<65x128xf32, #tpu.memory_space<vmem>>, %arg4: memref<33x64xf32, #tpu.memory_space<vmem>>, %arg5: memref<1x1xf32, #tpu.memory_space<smem>>, %arg6: memref<8x256xf32, #tpu.memory_space<vmem>>, %arg7: memref<8x256xf32, #tpu.memory_space<vmem>>) attributes {dimension_semantics = [], scalar_prefetch = 0 : i64, scratch_operands = 0 : i64, tpu.core_type = #tpu.core_type<tc>} {
    %c0 = arith.constant 0 : index
    %c0_0 = arith.constant 0 : index
    %0 = vector.load %arg0[%c0, %c0_0] : memref<8x1xi32, #tpu.memory_space<vmem>>, vector<8x1xi32>
    %1 = tpu.iota {dimensions = array<i32: 1>} : vector<8x64xi32>
    %2 = vector.broadcast %0 : vector<8x1xi32> to vector<8x64xi32>
    %3 = arith.cmpi eq, %1, %2 : vector<8x64xi32>
    %4 = arith.extui %3 : vector<8x64xi1> to vector<8x64xi32>
    %5 = arith.sitofp %4 : vector<8x64xi32> to vector<8x64xf32>
    %c0_1 = arith.constant 0 : index
    %c0_2 = arith.constant 0 : index
    %6 = vector.load %arg1[%c0_1, %c0_2] : memref<64x32xf32, #tpu.memory_space<vmem>>, vector<64x32xf32>
    %cst = arith.constant dense<0.000000e+00> : vector<8x32xf32>
    %7 = tpu.matmul %5, %6, %cst {dimension_numbers = #tpu.dot_dimension_numbers<[1], [0], [0], [1], [0, 0, 1, 1], [], []>} : vector<8x64xf32>, vector<64x32xf32>, vector<8x32xf32> -> vector<8x32xf32>
    %cst_3 = arith.constant dense<0.000000e+00> : vector<8xf32>
    %8 = vector.multi_reduction <add>, %7, %cst_3 [1] : vector<8x32xf32> to vector<8xf32>
    %9 = vector.shape_cast %8 : vector<8xf32> to vector<8x1xf32>
    %cst_4 = arith.constant 3.200000e+01 : f32
    %10 = vector.broadcast %cst_4 : f32 to vector<8x1xf32>
    %11 = arith.divf %9, %10 : vector<8x1xf32>
    %c0_5 = arith.constant 0 : index
    %c128 = arith.constant 128 : index
    %12 = vector.load %arg6[%c0_5, %c128] : memref<8x256xf32, #tpu.memory_space<vmem>>, vector<8x12xf32>
    %13 = tpu.concatenate %12, %11 in 1 : vector<8x12xf32>, vector<8x1xf32> -> vector<8x13xf32>
    %c0_6 = arith.constant 0 : index
    %c0_7 = arith.constant 0 : index
    %14 = vector.load %arg2[%c0_6, %c0_7] : memref<13x24xf32, #tpu.memory_space<vmem>>, vector<13x24xf32>
    %cst_8 = arith.constant dense<0.000000e+00> : vector<8x24xf32>
    %15 = tpu.matmul %13, %14, %cst_8 {dimension_numbers = #tpu.dot_dimension_numbers<[1], [0], [0], [1], [0, 0, 1, 1], [], []>} : vector<8x13xf32>, vector<13x24xf32>, vector<8x24xf32> -> vector<8x24xf32>
    %16 = vector.extract_strided_slice %15 {offsets = [0, 0], sizes = [8, 12], strides = [1, 1]} : vector<8x24xf32> to vector<8x12xf32>
    %17 = vector.extract_strided_slice %15 {offsets = [0, 12], sizes = [8, 12], strides = [1, 1]} : vector<8x24xf32> to vector<8x12xf32>
    %18 = arith.mulf %16, %16 : vector<8x12xf32>
    %19 = arith.mulf %17, %17 : vector<8x12xf32>
    %20 = arith.addf %18, %19 : vector<8x12xf32>
    %21 = math.sqrt %20 : vector<8x12xf32>
    %cst_9 = arith.constant dense<0.000000e+00> : vector<8xf32>
    %22 = vector.multi_reduction <add>, %21, %cst_9 [1] : vector<8x12xf32> to vector<8xf32>
    %23 = vector.shape_cast %22 : vector<8xf32> to vector<8x1xf32>
    %cst_10 = arith.constant 1.200000e+01 : f32
    %24 = vector.broadcast %cst_10 : f32 to vector<8x1xf32>
    %25 = arith.divf %23, %24 : vector<8x1xf32>
    %cst_11 = arith.constant 5.000000e-02 : f32
    %cst_12 = arith.constant 1.500000e+00 : f32
    %26 = vector.broadcast %cst_11 : f32 to vector<8x1xf32>
    %27 = arith.maximumf %26, %25 : vector<8x1xf32>
    %28 = vector.broadcast %cst_12 : f32 to vector<8x1xf32>
    %29 = arith.minimumf %28, %27 : vector<8x1xf32>
    %cst_13 = arith.constant 0.899999976 : f32
    %30 = vector.broadcast %cst_13 : f32 to vector<8x1xf32>
    %31 = arith.mulf %30, %29 : vector<8x1xf32>
    %32 = vector.shape_cast %29 : vector<8x1xf32> to vector<1x8x1xf32>
    %cst_14 = arith.constant dense<0.000000e+00> : vector<1xf32>
    %33 = vector.multi_reduction <add>, %32, %cst_14 [1, 2] : vector<1x8x1xf32> to vector<1xf32>
    %34 = vector.shape_cast %33 : vector<1xf32> to vector<1x1x1xf32>
    %35 = vector.extract %34[0, 0, 0] : f32 from vector<1x1x1xf32>
    %36 = vector.broadcast %35 : f32 to vector<1x1xf32>
    %cst_15 = arith.constant 8.000000e+00 : f32
    %37 = vector.broadcast %cst_15 : f32 to vector<1x1xf32>
    %38 = arith.divf %36, %37 : vector<1x1xf32>
    %cst_16 = arith.constant 1.000000e-01 : f32
    %39 = vector.broadcast %cst_16 : f32 to vector<1x1xf32>
    %40 = arith.mulf %39, %38 : vector<1x1xf32>
    %41 = vector.broadcast %40 : vector<1x1xf32> to vector<8x1xf32>
    %42 = arith.addf %31, %41 : vector<8x1xf32>
    %c0_17 = arith.constant 0 : index
    %c0_18 = arith.constant 0 : index
    %43 = memref.load %arg5[%c0_17, %c0_18] : memref<1x1xf32, #tpu.memory_space<smem>>
    %cst_19 = arith.constant 1.000000e-01 : f32
    %cst_20 = arith.constant 6.000000e+00 : f32
    %44 = arith.maximumf %cst_19, %43 : f32
    %45 = arith.minimumf %cst_20, %44 : f32
    %46 = vector.broadcast %45 : f32 to vector<8x32xf32>
    %47 = arith.mulf %46, %7 : vector<8x32xf32>
    %cst_21 = arith.constant 3.000000e-01 : f32
    %48 = vector.broadcast %cst_21 : f32 to vector<8x1xf32>
    %49 = arith.mulf %48, %42 : vector<8x1xf32>
    %50 = vector.broadcast %49 : vector<8x1xf32> to vector<8x32xf32>
    %51 = arith.subf %47, %50 : vector<8x32xf32>
    %52 = arith.negf %51 : vector<8x32xf32>
    %53 = math.exp %52 : vector<8x32xf32>
    %cst_22 = arith.constant 1.000000e+00 : f32
    %54 = vector.broadcast %cst_22 : f32 to vector<8x32xf32>
    %55 = arith.addf %54, %53 : vector<8x32xf32>
    %56 = arith.divf %54, %55 : vector<8x32xf32>
    %57 = arith.mulf %7, %56 : vector<8x32xf32>
    %cst_23 = arith.constant 1.000000e-01 : f32
    %58 = vector.broadcast %cst_23 : f32 to vector<8x32xf32>
    %59 = arith.mulf %58, %7 : vector<8x32xf32>
    %60 = math.sin %59 : vector<8x32xf32>
    %cst_24 = arith.constant 5.000000e-02 : f32
    %61 = vector.broadcast %cst_24 : f32 to vector<8x32xf32>
    %62 = arith.mulf %61, %60 : vector<8x32xf32>
    %63 = arith.addf %57, %62 : vector<8x32xf32>
    %c0_25 = arith.constant 0 : index
    %c64 = arith.constant 64 : index
    %64 = vector.load %arg6[%c0_25, %c64] : memref<8x256xf32, #tpu.memory_space<vmem>>, vector<8x32xf32>
    %c0_26 = arith.constant 0 : index
    %c96 = arith.constant 96 : index
    %65 = vector.load %arg6[%c0_26, %c96] : memref<8x256xf32, #tpu.memory_space<vmem>>, vector<8x32xf32>
    %cst_27 = arith.constant 1.000000e+00 : f32
    %66 = vector.broadcast %cst_27 : f32 to vector<8x1xf32>
    %67 = tpu.concatenate %63, %64, %66 in 1 : vector<8x32xf32>, vector<8x32xf32>, vector<8x1xf32> -> vector<8x65xf32>
    %c0_28 = arith.constant 0 : index
    %c0_29 = arith.constant 0 : index
    %68 = vector.load %arg3[%c0_28, %c0_29] : memref<65x128xf32, #tpu.memory_space<vmem>>, vector<65x128xf32>
    %cst_30 = arith.constant dense<0.000000e+00> : vector<8x128xf32>
    %69 = tpu.matmul %67, %68, %cst_30 {dimension_numbers = #tpu.dot_dimension_numbers<[1], [0], [0], [1], [0, 0, 1, 1], [], []>} : vector<8x65xf32>, vector<65x128xf32>, vector<8x128xf32> -> vector<8x128xf32>
    %70 = vector.extract_strided_slice %69 {offsets = [0, 0], sizes = [8, 32], strides = [1, 1]} : vector<8x128xf32> to vector<8x32xf32>
    %71 = arith.negf %70 : vector<8x32xf32>
    %72 = math.exp %71 : vector<8x32xf32>
    %cst_31 = arith.constant 1.000000e+00 : f32
    %73 = vector.broadcast %cst_31 : f32 to vector<8x32xf32>
    %74 = arith.addf %73, %72 : vector<8x32xf32>
    %75 = arith.divf %73, %74 : vector<8x32xf32>
    %76 = vector.extract_strided_slice %69 {offsets = [0, 32], sizes = [8, 32], strides = [1, 1]} : vector<8x128xf32> to vector<8x32xf32>
    %77 = arith.negf %76 : vector<8x32xf32>
    %78 = math.exp %77 : vector<8x32xf32>
    %cst_32 = arith.constant 1.000000e+00 : f32
    %79 = vector.broadcast %cst_32 : f32 to vector<8x32xf32>
    %80 = arith.addf %79, %78 : vector<8x32xf32>
    %81 = arith.divf %79, %80 : vector<8x32xf32>
    %82 = vector.extract_strided_slice %69 {offsets = [0, 64], sizes = [8, 32], strides = [1, 1]} : vector<8x128xf32> to vector<8x32xf32>
    %83 = math.tanh %82 : vector<8x32xf32>
    %84 = vector.extract_strided_slice %69 {offsets = [0, 96], sizes = [8, 32], strides = [1, 1]} : vector<8x128xf32> to vector<8x32xf32>
    %85 = arith.negf %84 : vector<8x32xf32>
    %86 = math.exp %85 : vector<8x32xf32>
    %cst_33 = arith.constant 1.000000e+00 : f32
    %87 = vector.broadcast %cst_33 : f32 to vector<8x32xf32>
    %88 = arith.addf %87, %86 : vector<8x32xf32>
    %89 = arith.divf %87, %88 : vector<8x32xf32>
    %90 = arith.mulf %81, %65 : vector<8x32xf32>
    %91 = arith.mulf %75, %83 : vector<8x32xf32>
    %92 = arith.addf %90, %91 : vector<8x32xf32>
    %93 = math.tanh %92 : vector<8x32xf32>
    %94 = arith.mulf %89, %93 : vector<8x32xf32>
    %95 = tpu.concatenate %94, %66 in 1 : vector<8x32xf32>, vector<8x1xf32> -> vector<8x33xf32>
    %c0_34 = arith.constant 0 : index
    %c0_35 = arith.constant 0 : index
    %96 = vector.load %arg4[%c0_34, %c0_35] : memref<33x64xf32, #tpu.memory_space<vmem>>, vector<33x64xf32>
    %cst_36 = arith.constant dense<0.000000e+00> : vector<8x64xf32>
    %97 = tpu.matmul %95, %96, %cst_36 {dimension_numbers = #tpu.dot_dimension_numbers<[1], [0], [0], [1], [0, 0, 1, 1], [], []>} : vector<8x33xf32>, vector<33x64xf32>, vector<8x64xf32> -> vector<8x64xf32>
    %98 = vector.extract_strided_slice %12 {offsets = [0, 1], sizes = [8, 11], strides = [1, 1]} : vector<8x12xf32> to vector<8x11xf32>
    %99 = tpu.concatenate %98, %11 in 1 : vector<8x11xf32>, vector<8x1xf32> -> vector<8x12xf32>
    %cst_37 = arith.constant 0.000000e+00 : f32
    %100 = vector.broadcast %cst_37 : f32 to vector<8x116xf32>
    %101 = tpu.concatenate %97, %94, %92, %99, %100 in 1 : vector<8x64xf32>, vector<8x32xf32>, vector<8x32xf32>, vector<8x12xf32>, vector<8x116xf32> -> vector<8x256xf32>
    %c0_38 = arith.constant 0 : index
    %c0_39 = arith.constant 0 : index
    %102 = vector.load %arg7[%c0_38, %c0_39] : memref<8x256xf32, #tpu.memory_space<vmem>>, vector<8x256xf32>
    tpu.vector_store %arg7[%c0_38, %c0_39], %101 {strides = array<i32>} : memref<8x256xf32, #tpu.memory_space<vmem>>, vector<8x256xf32>,
    return
  }
}

</mosaic_0001>

<bundles_post_ra>
// kernel: tpu_custom_call.1
= control target key start
LH: loop header
LB: loop body
LE: loop exit
PB: predicated region body
PF: predicated region fallthrough
CT: control target
= control target key end

     0   :  { %13 = vsyncpa [#allocation4], 0  ;;  %s925_s0 = inlined_call_operand.vmem [shape: s32[8,1], index: 0, kind: input, shape index: {}]   ;;  %s926_s1 = inlined_call_operand.vmem [shape: f32[64,32], index: 1, kind: input, shape index: {}]   ;;  %s927_s2 = inlined_call_operand.vmem [shape: f32[13,24], index: 2, kind: input, shape index: {}]   ;;  %s928_s3 = inlined_call_operand.vmem [shape: f32[65,128], index: 3, kind: input, shape index: {}]   ;;  %s929_s4 = inlined_call_operand.hbm [shape: f32[33,64], index: 4, kind: input, shape index: {}]   ;;  %s930_s5 = inlined_call_operand.<no memory space> [shape: f32[1,1], index: 5, kind: input, shape index: {}]   ;;  %s931_s6 = inlined_call_operand.hbm [shape: f32[8,256], index: 6, kind: input, shape index: {}, may-alias: {6,7}]   ;;  %s932_s7 = inlined_call_operand.hbm [shape: f32[8,256], index: 7, kind: output, shape index: {}, may-alias: {6,7}]  }
   0x1   :  { %14 = vsyncpa [#allocation7], 0 }
   0x2   :  { %15 = vsyncpa [#allocation5], 0  ;;  %s28_s26 = sshll.u32 %s929_s4, 4  ;;  %s678_s27 = smov [#allocation3]   ;;  %s29_s26 = int_to_ptr.hbm [resolvable:$true] %s28_s26 }
   0x3   :  { %s30_s28 = sshll.u32 %s678_s27, 4  ;;  %s44_s8 = sshll.u32 %s931_s6, 4  ;;  %s31_s28 = int_to_ptr.vmem [resolvable:$true] %s30_s28  ;;  %s45_s8 = int_to_ptr.hbm [resolvable:$true] %s44_s8 }
   0x4   :  { %s679_s9 = smov 128   ;;  %s680_s10 = smov 8  }
   0x5   :  { %36 = dma.hbm_to_vmem [thread:$0]  %s29_s26, 640, %s31_s28, [#allocation4], %s679_s9, %s679_s9, %s680_s10  }
   0x6   :  { %s681_s11 = smov [#allocation6]  }
   0x7   :  { %s46_s12 = sshll.u32 %s681_s11, 4  ;;  %s47_s12 = int_to_ptr.vmem [resolvable:$true] %s46_s12 }
   0x8   :  { %49 = dma.hbm_to_vmem [thread:$0]  %s45_s8, 256, %s47_s12, [#allocation7]  }
   0x9   :  { %672 = dma.done.wait [#allocation4], 640  }
   0xa   :  { %673 = vsyncadd [#allocation4], 4294966656 }
   0xb   :  { %674 = dma.done.wait [#allocation7], 256  }
   0xc   :  { %675 = vsyncadd [#allocation7], 4294967040  ;;  %v682_v0 = vmov 0   ;;  %v58_v1 = vld [vmem:[%s925_s0] sm:$0xff]  ;;  %v74_v2 = vld [vmem:[%s926_s1 + $0x38] sm:$0xff]  ;;  %v59_v10 = vlaneseq  ;;  %vm75_vm0 = vcmask 523264  }
   0xd   :  { %579 = vset.pattern.permute.xlu0 %v682_v0  ;;  %v73_v3 = vld [vmem:[%s926_s1 + $0x30] sm:$0xff]  ;;  %87 = vmatpush.msra.mxu0 %v74_v2  ;;  %v72_v4 = vld [vmem:[%s926_s1 + $0x28] sm:$0xff]  ;;  %v71_v5 = vld [vmem:[%s926_s1 + $0x20] sm:$0xff]  ;;  %v683_v13 = vmov 0.0   ;;  %vm99_vm2 = vcmask 261120   ;;  %vm120_vm3 = vcmask 1044480  }
   0xe   :  { %62 = vperm.xlu0 %579, %v58_v1   ;;  %v70_v6 = vld [vmem:[%s926_s1 + $0x18] sm:$0xff]  ;;  %v69_v7 = vld [vmem:[%s926_s1 + $0x10] sm:$0xff]  ;;  %v68_v8 = vld [vmem:[%s926_s1 + $0x8] sm:$0xff]  ;;  %v60_v11 = vand.u32 127, %v59_v10  ;;  %v684_v19 = vmov 32.0   ;;  %vm112_vm5 = vcmask 97280  }
   0xf   :  { %88 = vmatpush.msra.mxu0 %v73_v3  ;;  %v67_v9 = vld [vmem:[%s926_s1] sm:$0xff]  ;;  %v115_v17 = vld [vmem:[%s927_s2 + $0x8] sm:$0x1f]  ;;  %580 = vrcp.f32 %v684_v19  ;;  %v786_v27 = vld [vmem:[#allocation6 + $0x8] sm:$0xff]  ;;  %vm116_vm6 = vcmask 105472   ;;  %v686_v45 = vmov 12.0  }
  0x10   :  { %v114_v18 = vld [vmem:[%s927_s2] sm:$0xff]  ;;  %543 = vmatpush.msk.msra.mxu1 %vm120_vm3, %v115_v17  ;;  %s685_s2 = smov 116   ;;  %vm176_vm10 = vcmask 7168   ;;  %v687_v2 = vmov 920167782   ;;  %s693_s8 = smov 96  }
  0x11   :  { %89 = vmatpush.msra.mxu0 %v72_v4  ;;  %v688_v4 = vmov 1326507024   ;;  %v690_v10 = vmov 2475754826   ;;  %s695_s17 = smov 0.1  }
  0x12   :  { %139 = vmatpush.msra.mxu1 %v114_v18  ;;  %v692_v18 = vmov 683565275   ;;  %s199_s20 = smax.f32 %s695_s17, %s930_s5  ;;  %s696_s25 = smov 6.0  }
  0x13   :  { %90 = vmatpush.msra.mxu0 %v71_v5  ;;  %s200_s26 = smin.f32 %s696_s25, %s199_s20  ;;  %s698_s1 = smov 32  }
  0x14   :  { %s699_s30 = smov 127   ;;  %s530_s11 = sshll.u32 %s932_s7, 4  ;;  %s531_s11 = int_to_ptr.hbm [resolvable:$true] %s530_s11 }
  0x15   :  { %91 = vmatpush.msra.mxu0 %v70_v6  ;;  %v581_v20 = vpop.eup %580 }
  0x16   :  { %v104_v21 = vmul.f32 32.0, %v581_v20  ;;  %vm108_vm4 = vweird.f32 %v581_v20 }
  0x17   :  { %92 = vmatpush.msra.mxu0 %v69_v7 }
  0x18   :  { %v105_v22 = vsub.f32 1.0, %v104_v21 }
  0x19   :  { %93 = vmatpush.msra.mxu0 %v68_v8  ;;  %v689_v8 = vmov 2102212464  }
  0x1a   :  { %v106_v23 = vmul.f32 %v581_v20, %v105_v22 }
  0x1b   :  { %94 = vmatpush.msra.mxu0 %v67_v9 }
  0x1c   :  { %v107_v24 = vadd.f32 %v581_v20, %v106_v23 }
  0x1e   :  { %v109_v25 = vsel %vm108_vm4, %v581_v20, %v107_v24 }
  0x80   :  { %v63_v12 = vpop.permute.xlu0 %62 }
  0x81   :  { %vm64_vm1 = vcmp.eq.s32.totalorder %v60_v11, %v63_v12  ;;  %v691_v12 = vmov 2131351028  }
  0x82   :  { %v541_v14 = vsel %vm64_vm1, 1.0, %v683_v13 }
  0x83   :  { %542 = vmatmul.msk.f32.vlgmr.msra.gmra.mxu0 %vm75_vm0, %v541_v14 }
 0x100   :  { %v776_v15 = vpop.f32.mrf.mxu0 }
 0x101   :  { %v100_v16 = vsel %vm99_vm2, %v776_v15, 0.0  ;;  %v798_v57 = vmul.f32 0.1, %v776_v15 }
 0x102   :  { %101 = vadd.xlane.f32.xlu0 %v100_v16 }
 0x103   :  { %v229_v58 = vand.u32 2139095040, %v798_v57  ;;  %v226_v6 = vand.u32 2147483647, %v798_v57 }
 0x105   :  { %v230_v59 = vshrl.u32 %v229_v58, 23  ;;  %v233_v23 = vand.u32 8388607, %v226_v6 }
 0x107   :  { %v546_v60 = vadd.s32 4294967169, %v230_v59 }
 0x109   :  { %v236_v61 = vadd.s32 1, %v546_v60 }
 0x10b   :  { %vm237_vm11 = vcmp.gt.s32.totalorder %v236_v61, 0 }
 0x10c   :  { %v238_v62 = vsel %vm237_vm11, %v236_v61, 0  ;;  %vm860_vm11 = vcmp.le.f32.partialorder %v226_v6, 0.7853982  ;;  %v396_v6 = vld [vmem:[%s928_s3 + $0x30] sm:$0xff] }
 0x10d   :  { %v240_v63 = vand.u32 31, %v238_v62  ;;  %v806_v7 = vshrl.u32 %v238_v62, 5 }
 0x10f   :  { %v801_v1 = vsub.s32 32, %v240_v63  ;;  %v252_v9 = vshll.u32 %v689_v8, %v240_v63  ;;  %v255_v16 = vshll.u32 %v687_v2, %v240_v63  ;;  %v243_v19 = vshll.u32 %v692_v18, %v240_v63 }
 0x110   :  { %v246_v20 = vshll.u32 %v690_v10, %v240_v63  ;;  %v249_v21 = vshll.u32 %v691_v12, %v240_v63  ;;  %vm261_vm12 = vcmp.lt.s32.totalorder %v806_v7, 4  ;;  %vm258_vm13 = vcmp.lt.s32.totalorder %v806_v7, 1 }
 0x111   :  { %v253_v3 = vshrl.u32 %v687_v2, %v801_v1  ;;  %v256_v5 = vshrl.u32 %v688_v4, %v801_v1  ;;  %v244_v11 = vshrl.u32 %v690_v10, %v801_v1  ;;  %v247_v13 = vshrl.u32 %v691_v12, %v801_v1 }
 0x112   :  { %v250_v14 = vshrl.u32 %v689_v8, %v801_v1  ;;  %vm260_vm14 = vcmp.lt.s32.totalorder %v806_v7, 3  ;;  %vm259_vm15 = vcmp.lt.s32.totalorder %v806_v7, 2 }
 0x113   :  { %v254_v17 = vor.u32 %v253_v3, %v252_v9  ;;  %v257_v22 = vor.u32 %v256_v5, %v255_v16  ;;  %v245_v24 = vor.u32 %v244_v11, %v243_v19  ;;  %v242_v19 = vshrl.u32 %v692_v18, %v801_v1 }
 0x175   :  { %v102_v26 = vpop.xlane.xlu0 %101 }
 0x176   :  { %v788_v28 = vmul.f32 %v109_v25, %v102_v26  ;;  %v248_v25 = vor.u32 %v247_v13, %v246_v20  ;;  %v251_v26 = vor.u32 %v250_v14, %v249_v21  ;;  %v262_v21 = vsel %vm258_vm13, %v242_v19, %v245_v24  ;;  %v392_v19 = vld [vmem:[%s928_s3 + $0x10] sm:$0xff] }
 0x178   :  { %v113_v29 = vsel %vm112_vm5, %v786_v27, %v788_v28  ;;  %v263_v16 = vsel %vm261_vm12, %v251_v26, 2102212464 }
 0x179   :  { %544 = vmatmul.msk.f32.vlgmr.msra.gmra.mxu1 %vm116_vm6, %v113_v29  ;;  %v267_v29 = vsel %vm261_vm12, %v254_v17, 920167782 }
 0x1f6   :  { %v141_v30 = vpop.f32.mrf.mxu1 }
 0x1f7   :  { %v144_v31 = vmul.f32 %v141_v30, %v141_v30  ;;  %v271_v30 = vsel %vm261_vm12, %v257_v22, 1326507024  ;;  %vm403_vm12 = vcmask 1040384  }
 0x1f9   :  { %146 = vrot.lane.b32.xlu1 %v144_v31, %s685_s2  ;;  %s700_s2 = smov [#allocation8]  }
 0x1fa   :  { %s528_s9 = sshll.u32 %s700_s2, 4  ;;  %s529_s9 = int_to_ptr.vmem [resolvable:$true] %s528_s9 }
 0x26b   :  { %v147_v32 = vpop.permute.xlu1 %146 }
 0x26c   :  { %v149_v33 = vadd.f32 %v147_v32, %v144_v31  ;;  %v234_v31 = vor.u32 8388608, %v233_v23  ;;  %v266_v32 = vsel %vm258_vm13, %v245_v24, %v248_v25 }
 0x26e   :  { %582 = vrsqrt.f32 %v149_v33  ;;  %vm157_vm7 = vcmp.eq.f32.partialorder %v149_v33, inf  ;;  %v160_v41 = vand.u32 2147483648, %v149_v33  ;;  %vm159_vm8 = vcmp.eq.f32.partialorder %v149_v33, 0.0 }
 0x26f   :  { %584 = vrcp.f32 %v686_v45 }
 0x274   :  { %v583_v34 = vpop.eup %582 }
 0x275   :  { %v151_v35 = vmul.f32 %v583_v34, %v149_v33  ;;  %v585_v46 = vpop.eup %584 }
 0x276   :  { %v166_v47 = vmul.f32 12.0, %v585_v46  ;;  %vm170_vm9 = vweird.f32 %v585_v46 }
 0x277   :  { %v152_v36 = vmul.f32 %v583_v34, %v151_v35  ;;  %v272_v35 = vsel %vm260_vm14, %v254_v17, %v271_v30 }
 0x278   :  { %v167_v48 = vsub.f32 1.0, %v166_v47 }
 0x279   :  { %v153_v37 = vmul.f32 0.5, %v152_v36 }
 0x27a   :  { %v168_v49 = vmul.f32 %v585_v46, %v167_v48 }
 0x27b   :  { %v154_v38 = vsub.f32 1.5, %v153_v37 }
 0x27c   :  { %v169_v50 = vadd.f32 %v585_v46, %v168_v49 }
 0x27d   :  { %v155_v39 = vmul.f32 %v583_v34, %v154_v38  ;;  %v270_v34 = vsel %vm258_vm13, %v248_v25, %v251_v26  ;;  %v274_v38 = vshll.u32 %v234_v31, 8 }
 0x27e   :  { %v171_v51 = vsel %vm170_vm9, %v585_v46, %v169_v50  ;;  %v273_v37 = vsel %vm259_vm15, %v270_v34, %v272_v35 }
 0x27f   :  { %v156_v40 = vmul.f32 %v155_v39, %v149_v33  ;;  %v277_v45 = vand.u32 65535, %v273_v37  ;;  %v276_v46 = vshrl.u32 %v274_v38, 16 }
 0x281   :  { %v158_v42 = vsel %vm157_vm7, %v149_v33, %v156_v40  ;;  %v268_v33 = vsel %vm260_vm14, %v251_v26, %v267_v29  ;;  %v278_v40 = vshrl.u32 %v273_v37, 16  ;;  %v848_v26 = vld [vmem:[#allocation6] sm:$0xff] }
 0x282   :  { %v161_v43 = vsel %vm159_vm8, %v160_v41, %v158_v42  ;;  %v269_v36 = vsel %vm259_vm15, %v266_v32, %v268_v33  ;;  %v275_v41 = vand.u32 65535, %v274_v38 }
 0x283   :  { %v162_v44 = vsel %vm112_vm5, %v161_v43, 0.0  ;;  %v300_v39 = vshrl.u32 %v269_v36, 16  ;;  %v282_v62 = vmul.u32 %v278_v40, %v276_v46 }
 0x284   :  { %163 = vadd.xlane.f32.xlu1 %v162_v44  ;;  %v280_v43 = vmul.u32 %v278_v40, %v275_v41  ;;  %v299_v44 = vand.u32 65535, %v269_v36 }
 0x285   :  { %v302_v42 = vmul.u32 %v300_v39, %v275_v41  ;;  %v304_v61 = vmul.u32 %v300_v39, %v276_v46 }
 0x286   :  { %v283_v48 = vshll.u32 %v280_v43, 16  ;;  %v301_v49 = vmul.u32 %v299_v44, %v275_v41  ;;  %v303_v50 = vmul.u32 %v299_v44, %v276_v46  ;;  %v284_v10 = vshrl.u32 %v280_v43, 16 }
 0x287   :  { %v305_v47 = vshll.u32 %v302_v42, 16  ;;  %v306_v9 = vshrl.u32 %v302_v42, 16 }
 0x288   :  { %v308_v13 = vshrl.u32 %v303_v50, 16 }
 0x289   :  { %vm309_vm1 = vc.u32 %v301_v49, %v305_v47 }
 0x28a   :  { %v310_v59 = vsel %vm309_vm1, 1, %v682_v0 }
 0x28b   :  { %v312_v63 = vadd.s32 %v310_v59, %v304_v61 }
 0x2f7   :  { %v164_v52 = vpop.xlane.xlu1 %163 }
 0x2f8   :  { %v172_v53 = vmul.f32 %v171_v51, %v164_v52  ;;  %v279_v51 = vmul.u32 %v277_v45, %v275_v41  ;;  %v281_v52 = vmul.u32 %v277_v45, %v276_v46 }
 0x2fa   :  { %v173_v54 = vmax.f32 %v172_v53, 0.05  ;;  %v311_v53 = vadd.s32 %v305_v47, %v301_v49  ;;  %vm287_vm3 = vc.u32 %v279_v51, %v283_v48  ;;  %v285_v58 = vshll.u32 %v281_v52, 16 }
 0x2fb   :  { %v288_v60 = vsel %vm287_vm3, 1, %v682_v0  ;;  %v286_v14 = vshrl.u32 %v281_v52, 16  ;;  %v694_v52 = vmov 8.0  }
 0x2fc   :  { %v794_v55 = vmin.f32 %v173_v54, 1.5  ;;  %v289_v54 = vadd.s32 %v283_v48, %v279_v51  ;;  %v290_v2 = vadd.s32 %v288_v60, %v282_v62  ;;  %586 = vrcp.f32 %v694_v52 }
 0x2fe   :  { %v177_v56 = vsel %vm176_vm10, %v794_v55, 0.0  ;;  %vm291_vm6 = vc.u32 %v289_v54, %v285_v58  ;;  %vm228_vm10 = vcmp.lt.s32.totalorder %v798_v57, 0 }
 0x2ff   :  { %178 = vadd.xlane.f32.xlu2 %v177_v56  ;;  %v307_v56 = vshll.u32 %v303_v50, 16  ;;  %v292_v4 = vsel %vm291_vm6, 1, %v682_v0 }
 0x300   :  { %v294_v8 = vadd.s32 %v292_v4, %v290_v2  ;;  %v398_v4 = vld [vmem:[%s928_s3 + $0x40] sm:$0x1] }
 0x301   :  { %vm313_vm4 = vc.u32 %v311_v53, %v307_v56  ;;  %v315_v22 = vadd.s32 %v311_v53, %v307_v56  ;;  %549 = vmatpush.msk.msra.mxu2 %vm403_vm12, %v398_v4 }
 0x302   :  { %v314_v3 = vsel %vm313_vm4, 1, %v682_v0  ;;  %v295_v12 = vadd.s32 %v294_v8, %v284_v10  ;;  %v264_v0 = vsel %vm260_vm14, %v248_v25, %v263_v16  ;;  %v587_v58 = vpop.eup %586  ;;  %vm369_vm4 = vweird.f32 %v798_v57 }
 0x303   :  { %v316_v5 = vadd.s32 %v314_v3, %v312_v63  ;;  %v265_v29 = vsel %vm259_vm15, %v262_v21, %v264_v0  ;;  %v189_v60 = vmul.f32 8.0, %v587_v58  ;;  %vm193_vm13 = vweird.f32 %v587_v58  ;;  %v391_v21 = vld [vmem:[%s928_s3 + $0x8] sm:$0xff] }
 0x304   :  { %v296_v20 = vadd.s32 %v295_v12, %v286_v14  ;;  %v319_v31 = vmul.u32 %v274_v38, %v265_v29  ;;  %v394_v12 = vld [vmem:[%s928_s3 + $0x20] sm:$0xff]  ;;  %v393_v14 = vld [vmem:[%s928_s3 + $0x18] sm:$0xff]  ;;  %v201_v29 = vstv %s200_s26 }
 0x305   :  { %v317_v11 = vadd.s32 %v316_v5, %v306_v9  ;;  %v190_v62 = vsub.f32 1.0, %v189_v60  ;;  %v397_v5 = vld [vmem:[%s928_s3 + $0x38] sm:$0xff] }
 0x306   :  { %vm321_vm7 = vc.u32 %v296_v20, %v315_v22  ;;  %v320_v47 = vadd.s32 %v315_v22, %v296_v20  ;;  %415 = vmatpush.msra.mxu2 %v397_v5  ;;  %v175_v22 = vmul.f32 0.9, %v794_v55  ;;  %v390_v55 = vld [vmem:[%s928_s3] sm:$0xff] }
 0x307   :  { %v318_v17 = vadd.s32 %v317_v11, %v308_v13  ;;  %v191_v3 = vmul.f32 %v587_v58, %v190_v62  ;;  %v395_v11 = vld [vmem:[%s928_s3 + $0x28] sm:$0xff]  ;;  %s697_s3 = smov 64  }
 0x308   :  { %416 = vmatpush.msra.mxu2 %v396_v6 }
 0x309   :  { %v322_v23 = vadd.s32 1, %v318_v17  ;;  %v192_v10 = vadd.f32 %v587_v58, %v191_v3 }
 0x30a   :  { %417 = vmatpush.msra.mxu2 %v395_v11 }
 0x30b   :  { %v323_v30 = vsel %vm321_vm7, %v322_v23, %v318_v17  ;;  %v194_v13 = vsel %vm193_vm13, %v587_v58, %v192_v10 }
 0x30c   :  { %v324_v32 = vadd.s32 %v323_v30, %v319_v31  ;;  %418 = vmatpush.msra.mxu2 %v394_v12 }
 0x30e   :  { %v325_v1 = vadd.s32 536870912, %v324_v32  ;;  %419 = vmatpush.msra.mxu2 %v393_v14 }
 0x310   :  { %v852_v18 = vshrl.u32 %v325_v1, 30  ;;  %420 = vmatpush.msra.mxu2 %v392_v19  ;;  %v202_v1 = vmul.f32 %v201_v29, %v776_v15 }
 0x312   :  { %v327_v24 = vshll.u32 %v852_v18, 30  ;;  %421 = vmatpush.msra.mxu2 %v391_v21 }
 0x314   :  { %v328_v25 = vsub.s32 %v324_v32, %v327_v24  ;;  %422 = vmatpush.msra.mxu2 %v390_v55 }
 0x316   :  { %v330_v35 = vsub.s32 0, %v328_v25  ;;  %vm329_vm8 = vcmp.lt.s32.totalorder %v328_v25, 0 }
 0x317   :  { %385 = vrot.lane.b32.xlu2 %v848_v26, %s693_s8 }
 0x318   :  { %v331_v37 = vsel %vm329_vm8, %v330_v35, %v328_v25 }
 0x319   :  { %v332_v39 = vclz %v331_v37 }
 0x31b   :  { %v547_v42 = vadd.s32 4294967294, %v332_v39 }
 0x31d   :  { %vm548_vm9 = vcmp.lt.s32.totalorder %v547_v42, 0 }
 0x31e   :  { %v335_v43 = vsel %vm548_vm9, 0, %v547_v42  ;;  %vm399_vm9 = vcmask 531456  }
 0x31f   :  { %v340_v44 = vsub.s32 4294967266, %v335_v43  ;;  %v336_v46 = vsub.s32 32, %v335_v43  ;;  %v337_v50 = vshll.u32 %v328_v25, %v335_v43 }
 0x321   :  { %v341_v45 = vadd.s32 127, %v340_v44  ;;  %v338_v49 = vshrl.u32 %v320_v47, %v336_v46 }
 0x323   :  { %v342_v48 = vshll.u32 %v341_v45, 23  ;;  %v339_v53 = vor.u32 %v338_v49, %v337_v50 }
 0x325   :  { %v343_v51 = vor.u32 4788187, %v342_v48  ;;  %v346_v56 = vcvt.s32.f32 %v339_v53 }
 0x327   :  { %v344_v54 = vand.u32 2147483647, %v343_v51 }
 0x329   :  { %v347_v59 = vmul.f32 %v346_v56, %v344_v54 }
 0x32b   :  { %v348_v61 = vxor.u32 2147483648, %v347_v59 }
 0x32d   :  { %v349_v63 = vsel %vm228_vm10, %v348_v61, %v347_v59 }
 0x32e   :  { %v352_v8 = vsel %vm860_vm11, %v798_v57, %v349_v63 }
 0x32f   :  { %v354_v9 = vmul.f32 %v352_v8, %v352_v8 }
 0x331   :  { %v362_v16 = vmul.f32 -0.00019511016, %v354_v9  ;;  %v355_v30 = vmul.f32 -0.001358992, %v354_v9 }
 0x333   :  { %v363_v0 = vadd.f32 0.008332121, %v362_v16  ;;  %v356_v25 = vadd.f32 0.041655596, %v355_v30 }
 0x335   :  { %v364_v32 = vmul.f32 %v363_v0, %v354_v9 }
 0x372   :  { %v179_v33 = vpop.xlane.xlu2 %178 }
 0x373   :  { %v180_v34 = vrot.slane %v179_v33, 4 }
 0x375   :  { %v181_v7 = vadd.f32 %v180_v34, %v179_v33  ;;  %v365_v34 = vadd.f32 -0.16666654, %v364_v32 }
 0x377   :  { %v182_v36 = vrot.slane %v181_v7, 2  ;;  %v366_v37 = vmul.f32 %v365_v34, %v354_v9 }
 0x379   :  { %v183_v38 = vadd.f32 %v182_v36, %v181_v7  ;;  %v350_v7 = vsub.s32 4, %v852_v18  ;;  %v357_v36 = vmul.f32 %v356_v25, %v354_v9 }
 0x37b   :  { %v184_v40 = vrot.slane %v183_v38, 1  ;;  %v358_v39 = vadd.f32 -0.4999988, %v357_v36  ;;  %v475_v36 = vld [vmem:[#allocation3 + $0x18] sm:$0xff] }
 0x37d   :  { %v185_v41 = vadd.f32 %v184_v40, %v183_v38  ;;  %v351_v38 = vsel %vm228_vm10, %v350_v7, %v852_v18  ;;  %v359_v44 = vmul.f32 %v358_v39, %v354_v9 }
 0x37e   :  { %v353_v40 = vsel %vm860_vm11, 0, %v351_v38  ;;  %v473_v38 = vld [vmem:[#allocation3 + $0x8] sm:$0xff] }
 0x37f   :  { %554 = vpush %v185_v41  ;;  %v367_v41 = vadd.f32 1.0, %v366_v37  ;;  %v370_v45 = vadd.s32 3, %v353_v40  ;;  %v360_v47 = vadd.f32 1.0, %v359_v44  ;;  %v474_v37 = vld [vmem:[#allocation3 + $0x10] sm:$0xff] }
 0x381   :  { %v368_v46 = vmul.f32 %v367_v41, %v352_v8  ;;  %v371_v48 = vand.u32 3, %v370_v45  ;;  %v377_v51 = vxor.u32 2147483648, %v360_v47  ;;  %v386_v8 = vpop.permute.xlu2 %385 }
 0x383   :  { %v374_v49 = vxor.u32 2147483648, %v368_v46  ;;  %vm373_vm14 = vcmp.eq.s32.totalorder %v371_v48, 0  ;;  %vm376_vm15 = vcmp.eq.s32.totalorder %v371_v48, 2  ;;  %vm372_vm1 = vcmp.lt.s32.totalorder %v371_v48, 2 }
 0x384   :  { %v378_v54 = vsel %vm376_vm15, %v377_v51, %v368_v46  ;;  %vm508_vm15 = vcmask 89088  }
 0x385   :  { %v375_v53 = vsel %vm373_vm14, %v360_v47, %v374_v49 }
 0x386   :  { %v379_v58 = vsel %vm372_vm1, %v375_v53, %v378_v54  ;;  %vm518_vm1 = vcmask 785408  }
 0x387   :  { %v380_v62 = vsel %vm369_vm4, nan, %v379_v58 }
 0x388   :  { %v381_v4 = vmul.f32 0.05, %v380_v62 }
 0x3b0   :  { %s555_s22 = spop %554 }
 0x3b1   :  { %v187_v17 = vstv %s555_s22 }
 0x3b2   :  { %v195_v20 = vmul.f32 %v194_v13, %v187_v17 }
 0x3b4   :  { %v196_v23 = vmul.f32 0.1, %v195_v20 }
 0x3b6   :  { %v197_v31 = vadd.f32 %v196_v23, %v175_v22 }
 0x3b8   :  { %v203_v24 = vmul.f32 0.3, %v197_v31 }
 0x3ba   :  { %v204_v33 = vsub.f32 %v202_v1, %v203_v24 }
 0x3bc   :  { %v545_v35 = vmul.f32 -1.442695, %v204_v33 }
 0x3be   :  { %588 = vpow2.f32 %v545_v35 }
 0x3c4   :  { %v589_v42 = vpop.eup %588 }
 0x3c5   :  { %v208_v43 = vadd.f32 1.0, %v589_v42 }
 0x3c7   :  { %590 = vrcp.f32 %v208_v43  ;;  %v220_v56 = vand.u32 2147483648, %v208_v43  ;;  %v218_v60 = vand.u32 2147483647, %v208_v43  ;;  %vm214_vm6 = vweird.f32 %v208_v43 }
 0x3c9   :  { %v221_v63 = vor.u32 1.1754944e-38, %v220_v56  ;;  %vm219_vm8 = vcmp.eq.f32.partialorder %v218_v60, 8.507059e+37 }
 0x3cd   :  { %v591_v50 = vpop.eup %590 }
 0x3ce   :  { %v210_v52 = vmul.f32 %v591_v50, %v208_v43  ;;  %vm215_vm3 = vweird.f32 %v591_v50 }
 0x3cf   :  { %vm216_vm7 = vmor %vm214_vm6, %vm215_vm3 }
 0x3d0   :  { %v211_v18 = vsub.f32 1.0, %v210_v52 }
 0x3d2   :  { %v212_v59 = vmul.f32 %v591_v50, %v211_v18 }
 0x3d4   :  { %v213_v61 = vadd.f32 %v591_v50, %v212_v59 }
 0x3d6   :  { %v217_v2 = vsel %vm216_vm7, %v591_v50, %v213_v61 }
 0x3d7   :  { %v222_v3 = vsel %vm219_vm8, %v221_v63, %v217_v2 }
 0x3d8   :  { %v224_v5 = vmul.f32 %v222_v3, %v776_v15 }
 0x3da   :  { %v382_v6 = vadd.f32 %v381_v4, %v224_v5 }
 0x3dc   :  { %v388_v9 = vsel %vm99_vm2, %v382_v6, %v386_v8 }
 0x3dd   :  { %v389_v10 = vsel %vm75_vm0, %v388_v9, 1.0 }
 0x3de   :  { %550 = vmatmul.msk.f32.vlgmr.msra.gmra.mxu2 %vm399_vm9, %v389_v10 }
 0x461   :  { %v424_v57 = vpop.f32.mrf.mxu2 }
 0x462   :  { %592 = vtanh.f32 %v424_v57  ;;  %v551_v12 = vmul.f32 -1.442695, %v424_v57 }
 0x464   :  { %594 = vpow2.f32 %v551_v12 }
 0x468   :  { %v593_v11 = vpop.eup %592 }
 0x469   :  { %452 = vrot.lane.b32.xlu2 %v593_v11, %s697_s3 }
 0x46a   :  { %v595_v15 = vpop.eup %594 }
 0x46b   :  { %v430_v13 = vadd.f32 1.0, %v595_v15 }
 0x46d   :  { %596 = vrcp.f32 %v430_v13  ;;  %v442_v21 = vand.u32 2147483648, %v430_v13  ;;  %vm436_vm11 = vweird.f32 %v430_v13  ;;  %v440_v0 = vand.u32 2147483647, %v430_v13 }
 0x46f   :  { %v443_v23 = vor.u32 1.1754944e-38, %v442_v21  ;;  %vm441_vm14 = vcmp.eq.f32.partialorder %v440_v0, 8.507059e+37 }
 0x471   :  { %447 = vrot.lane.b32.xlu2 %v848_v26, %s697_s3 }
 0x473   :  { %v597_v14 = vpop.eup %596 }
 0x474   :  { %v432_v16 = vmul.f32 %v597_v14, %v430_v13  ;;  %vm437_vm10 = vweird.f32 %v597_v14 }
 0x475   :  { %vm438_vm13 = vmor %vm436_vm11, %vm437_vm10 }
 0x476   :  { %v433_v17 = vsub.f32 1.0, %v432_v16 }
 0x478   :  { %v434_v19 = vmul.f32 %v597_v14, %v433_v17 }
 0x47a   :  { %v435_v20 = vadd.f32 %v597_v14, %v434_v19 }
 0x47c   :  { %v439_v22 = vsel %vm438_vm13, %v597_v14, %v435_v20 }
 0x47d   :  { %v444_v26 = vsel %vm441_vm14, %v443_v23, %v439_v22 }
 0x4c3   :  { %v453_v29 = vpop.permute.xlu2 %452 }
 0x4c4   :  { %v455_v30 = vmul.f32 %v453_v29, %v444_v26 }
 0x4c6   :  { %457 = vrot.lane.b32.xlu2 %v455_v30, %s698_s1 }
 0x4cb   :  { %v448_v31 = vpop.permute.xlu2 %447 }
 0x4cc   :  { %v450_v32 = vmul.f32 %v448_v31, %v444_v26 }
 0x4ce   :  { %505 = vrot.lane.b32.xlu2 %v786_v27, %s699_s30  ;;  %v476_v27 = vld [vmem:[#allocation3 + $0x20] sm:$0x1] }
 0x4cf   :  { %552 = vmatpush.msk.msra.mxu3 %vm403_vm12, %v476_v27 }
 0x4d1   :  { %496 = vmatpush.msra.mxu3 %v475_v36 }
 0x4d3   :  { %497 = vmatpush.msra.mxu3 %v474_v37 }
 0x4d5   :  { %498 = vmatpush.msra.mxu3 %v473_v38 }
 0x520   :  { %v458_v1 = vpop.permute.xlu2 %457 }
 0x521   :  { %v460_v24 = vadd.f32 %v458_v1, %v450_v32 }
 0x523   :  { %598 = vtanh.f32 %v460_v24 }
 0x528   :  { %v506_v25 = vpop.permute.xlu2 %505 }
 0x529   :  { %v599_v33 = vpop.eup %598  ;;  %v509_v34 = vsel %vm508_vm15, %v506_v25, %v788_v28  ;;  %v472_v28 = vld [vmem:[#allocation3] sm:$0xff] }
 0x52a   :  { %v520_v35 = vsel %vm112_vm5, %v509_v34, 0.0  ;;  %463 = vrot.lane.b32.xlu0 %v599_v33, %s697_s3  ;;  %499 = vmatpush.msra.mxu3 %v472_v28  ;;  %vm477_vm5 = vcmask 269312  }
 0x52b   :  { %522 = vst [vmem:[#allocation8 + $0x8] sm:$0xff] %v520_v35 }
 0x532   :  { %514 = vrot.lane.b32.xlu0 %v460_v24, %s697_s3 }
 0x59c   :  { %v464_v7 = vpop.permute.xlu0 %463 }
 0x59d   :  { %v466_v55 = vmul.f32 %v464_v7, %v444_v26 }
 0x59f   :  { %510 = vrot.lane.b32.xlu2 %v466_v55, %s693_s8  ;;  %468 = vrot.lane.b32.xlu1 %v466_v55, %s698_s1 }
 0x5a4   :  { %v515_v43 = vpop.permute.xlu0 %514 }
 0x5f9   :  { %v511_v41 = vpop.permute.xlu2 %510 }
 0x611   :  { %v469_v39 = vpop.permute.xlu1 %468 }
 0x612   :  { %v471_v40 = vsel %vm99_vm2, %v469_v39, 1.0 }
 0x613   :  { %553 = vmatmul.msk.f32.vlgmr.msra.gmra.mxu3 %vm477_vm5, %v471_v40 }
 0x696   :  { %v501_v42 = vpop.f32.mrf.mxu3 }
 0x697   :  { %v517_v44 = vsel %vm75_vm0, %v501_v42, %v511_v41 }
 0x698   :  { %v519_v45 = vsel %vm518_vm1, %v517_v44, %v515_v43 }
 0x699   :  { %521 = vst [vmem:[#allocation8] sm:$0xff] %v519_v45 }
 0x69a   :  { %533 = dma.vmem_to_hbm [thread:$0]  %s529_s9, 256, %s531_s11, [#allocation5]  }
 0x69b   :  { %676 = dma.done.wait [#allocation5], 256  }
 0x69c   :  { %677 = vsyncadd [#allocation5], 4294967040 }
 0x69d   :  { %538 = vsyncpa [#allocation4], 1 }
 0x69e   :  { %539 = vsyncpa [#allocation7], 1 }
 0x69f   :  { %540 = vsyncpa [#allocation5], 1 }

</bundles_post_ra>
